<compile_context>
chip_gen: v5e
topology: v5e:2x2
jax: 0.10.0
libtpu: 0.0.40
codegen_flags: <defaults>
</compile_context>

<pallas_src>
import jax
import jax.numpy as jnp
from jax.experimental import pallas as pl
from jax.experimental.pallas import tpu as pltpu

INPUT_DIM = 32   # nn.Linear(INPUT_DIM, 50) — free hyperparameter in the spec; pick 32
HIDDEN = 50
OUT = 1
PACKED = INPUT_DIM + 1   # [w_eff (D lanes) | b_eff (1 lane)]


def _logreg_folded_kernel(x_ref, p_ref, o_ref):
    """x_ref: (bm, D) f32; p_ref: (1, D+1) f32 packed [w_eff | b_eff]; o_ref: (bm, 1)."""
    x = x_ref[...]                              # (bm, D)
    w = p_ref[:, :INPUT_DIM]                    # (1, D)   — static slice, no copy cost
    b = p_ref[:, INPUT_DIM:]                    # (1, 1)
    # VPU broadcast-multiply + XLU lane reduce (no MXU pass for an N=1 output).
    y = jnp.sum(x * w, axis=-1, keepdims=True) + b      # (bm, 1) f32
    # Exact sigmoid: exp on EUP, one divide on VPU; kept exact for the 1e-5 check.
    o_ref[...] = (1.0 / (1.0 + jnp.exp(-y))).astype(o_ref.dtype)


def fold_params(w1, b1, w2, b2):
    """Fold fc1/fc2 (no nonlinearity between them) into one packed (1, D+1) array.

    w1: (D, 50), b1: (1, 50), w2: (50, 1), b2: (1, 1)  (weights stored as (in, out),
    i.e. transposed relative to PyTorch's (out, in) layout).
    """
    w_eff = jnp.dot(w1, w2)          # (D, 1)
    b_eff = jnp.dot(b1, w2) + b2     # (1, 1)
    return jnp.concatenate([w_eff.T, b_eff], axis=-1).astype(jnp.float32)  # (1, D+1)


def starting_network_forward(x, packed):
    """Small-batch path: no grid, whole arrays resident in VMEM, single kernel invocation."""
    B = x.shape[0]
    return pl.pallas_call(
        _logreg_folded_kernel,
        out_shape=jax.ShapeDtypeStruct((B, OUT), jnp.float32),
        in_specs=[
            pl.BlockSpec(memory_space=pltpu.MemorySpace.VMEM),
            pl.BlockSpec(memory_space=pltpu.MemorySpace.VMEM),
        ],
        out_specs=pl.BlockSpec(memory_space=pltpu.MemorySpace.VMEM),
    )(x, packed)


def starting_network_forward_tiled(x, packed, *, tm=512):
    """Large-batch path: tile the batch dim so x streams from HBM with auto double-buffering.

    Weights stay resident (constant block index).  The batch axis is marked "parallel"
    so it shards across both TensorCores on v7x (no effect on single-TC v5e/v6e).
    """
    B = x.shape[0]
    grid = (pl.cdiv(B, tm),)
    return pl.pallas_call(
        _logreg_folded_kernel,
        out_shape=jax.ShapeDtypeStruct((B, OUT), jnp.float32),
        grid=grid,
        in_specs=[
            pl.BlockSpec((tm, INPUT_DIM), lambda i: (i, 0)),
            pl.BlockSpec((1, PACKED), lambda i: (0, 0)),
        ],
        out_specs=pl.BlockSpec((tm, OUT), lambda i: (i, 0)),
        compiler_params=pltpu.CompilerParams(dimension_semantics=("parallel",)),
    )(x, packed)


def starting_network_forward_raw(x, w1, b1, w2, b2):
    """Convenience wrapper that matches the original module's parameterization."""
    return starting_network_forward(x, fold_params(w1, b1, w2, b2))


def _init_params(key):
    # Deterministic init mimicking PyTorch's default Linear init
    # (uniform(-1/sqrt(fan_in), 1/sqrt(fan_in))) — synthetic weights, no checkpoint.
    k1, k2, k3, k4 = jax.random.split(key, 4)
    lim1 = 1.0 / jnp.sqrt(jnp.float32(INPUT_DIM))
    lim2 = 1.0 / jnp.sqrt(jnp.float32(HIDDEN))
    w1 = jax.random.uniform(k1, (INPUT_DIM, HIDDEN), jnp.float32, -lim1, lim1)
    b1 = jax.random.uniform(k2, (1, HIDDEN), jnp.float32, -lim1, lim1)
    w2 = jax.random.uniform(k3, (HIDDEN, OUT), jnp.float32, -lim2, lim2)
    b2 = jax.random.uniform(k4, (1, OUT), jnp.float32, -lim2, lim2)
    return w1, b1, w2, b2


if __name__ == "__main__":
    key = jax.random.PRNGKey(0)
    kx, kp = jax.random.split(key)

    B = 8
    x = jax.random.normal(kx, (B, INPUT_DIM), jnp.float32)
    w1, b1, w2, b2 = _init_params(kp)

    # Fold once (init-time cost), then the per-forward path is a single kernel.
    packed = fold_params(w1, b1, w2, b2)

    out = starting_network_forward(x, packed)
    out = jax.block_until_ready(out)

    # Exercise the batch-tiled / v7x-parallel path as well (tiny tile so shapes stay small).
    out_tiled = starting_network_forward_tiled(x, packed, tm=8)
    out_tiled = jax.block_until_ready(out_tiled)

    # Pure-JAX reference computed the ORIGINAL two-layer way (fc1 -> fc2 -> sigmoid).
    ref = jax.nn.sigmoid((x @ w1 + b1) @ w2 + b2)
    assert out.shape == (B, OUT), out.shape
    assert jnp.allclose(out, ref, atol=1e-5, rtol=1e-5), "mismatch vs reference (gridless)"
    assert jnp.allclose(out_tiled, ref, atol=1e-5, rtol=1e-5), "mismatch vs reference (tiled)"

    print("KERNEL_OK")
</pallas_src>

<mosaic_0001>
module attributes {stable_mosaic.version = 11 : i64} {
  func.func @_logreg_folded_kernel(%arg0: memref<8x32xf32, #tpu.memory_space<vmem>>, %arg1: memref<1x33xf32, #tpu.memory_space<vmem>>, %arg2: memref<8x1xf32, #tpu.memory_space<vmem>>) attributes {dimension_semantics = [], scalar_prefetch = 0 : i64, scratch_operands = 0 : i64, tpu.core_type = #tpu.core_type<tc>} {
    %c0 = arith.constant 0 : index
    %c0_0 = arith.constant 0 : index
    %0 = vector.load %arg0[%c0, %c0_0] : memref<8x32xf32, #tpu.memory_space<vmem>>, vector<8x32xf32>
    %c0_1 = arith.constant 0 : index
    %c0_2 = arith.constant 0 : index
    %1 = vector.load %arg1[%c0_1, %c0_2] : memref<1x33xf32, #tpu.memory_space<vmem>>, vector<1x32xf32>
    %c0_3 = arith.constant 0 : index
    %c32 = arith.constant 32 : index
    %2 = vector.load %arg1[%c0_3, %c32] : memref<1x33xf32, #tpu.memory_space<vmem>>, vector<1x1xf32>
    %3 = vector.broadcast %1 : vector<1x32xf32> to vector<8x32xf32>
    %4 = arith.mulf %0, %3 : vector<8x32xf32>
    %cst = arith.constant dense<0.000000e+00> : vector<8xf32>
    %5 = vector.multi_reduction <add>, %4, %cst [1] : vector<8x32xf32> to vector<8xf32>
    %6 = vector.shape_cast %5 : vector<8xf32> to vector<8x1xf32>
    %7 = vector.broadcast %2 : vector<1x1xf32> to vector<8x1xf32>
    %8 = arith.addf %6, %7 : vector<8x1xf32>
    %cst_4 = arith.constant 0.000000e+00 : f32
    %9 = vector.broadcast %cst_4 : f32 to vector<8x1xf32>
    %10 = arith.subf %9, %8 : vector<8x1xf32>
    %11 = math.exp %10 : vector<8x1xf32>
    %cst_5 = arith.constant 1.000000e+00 : f32
    %12 = vector.broadcast %cst_5 : f32 to vector<8x1xf32>
    %13 = arith.addf %12, %11 : vector<8x1xf32>
    %cst_6 = arith.constant 1.000000e+00 : f32
    %14 = vector.broadcast %cst_6 : f32 to vector<8x1xf32>
    %15 = arith.divf %14, %13 : vector<8x1xf32>
    %c0_7 = arith.constant 0 : index
    %c0_8 = arith.constant 0 : index
    %16 = vector.load %arg2[%c0_7, %c0_8] : memref<8x1xf32, #tpu.memory_space<vmem>>, vector<8x1xf32>
    tpu.vector_store %arg2[%c0_7, %c0_8], %15 {strides = array<i32>} : memref<8x1xf32, #tpu.memory_space<vmem>>, vector<8x1xf32>,
    return
  }
}

</mosaic_0001>

<bundles_post_ra>
// kernel: tpu_custom_call.1
= control target key start
LH: loop header
LB: loop body
LE: loop exit
PB: predicated region body
PF: predicated region fallthrough
CT: control target
= control target key end

     0   :  { %7 = vsyncpa [#allocation3], 0  ;;  %s168_s0 = inlined_call_operand.hbm [shape: f32[8,32], index: 0, kind: input, shape index: {}]   ;;  %s169_s1 = inlined_call_operand.hbm [shape: f32[1,33], index: 1, kind: input, shape index: {}]   ;;  %s170_s2 = inlined_call_operand.vmem [shape: f32[8,1], index: 2, kind: output, shape index: {}]  }
   0x1   :  { %s14_s11 = sshll.u32 %s168_s0, 4  ;;  %s15_s11 = int_to_ptr.hbm [resolvable:$true] %s14_s11 }
   0x2   :  { %8 = vsyncpa [#allocation5], 0  ;;  %s141_s12 = smov [#allocation2]   ;;  %s25_s16 = sshll.u32 %s169_s1, 4  ;;  %s26_s16 = int_to_ptr.hbm [resolvable:$true] %s25_s16 }
   0x3   :  { %s16_s13 = sshll.u32 %s141_s12, 4  ;;  %s142_s17 = smov [#allocation4]   ;;  %s17_s13 = int_to_ptr.vmem [resolvable:$true] %s16_s13 }
   0x4   :  { %19 = dma.hbm_to_vmem [thread:$0]  %s15_s11, 128, %s17_s13, [#allocation3]  }
   0x5   :  { %s27_s18 = sshll.u32 %s142_s17, 4  ;;  %s28_s18 = int_to_ptr.vmem [resolvable:$true] %s27_s18 }
   0x6   :  { %30 = dma.hbm_to_vmem [thread:$0]  %s26_s16, 16, %s28_s18, [#allocation5]  }
   0x7   :  { %137 = dma.done.wait [#allocation3], 128  }
   0x8   :  { %138 = vsyncadd [#allocation3], 4294967168 }
   0x9   :  { %139 = dma.done.wait [#allocation5], 16  }
   0xa   :  { %140 = vsyncadd [#allocation5], 4294967280  ;;  %v39_v0 = vld [vmem:[#allocation2] sm:$0xff]  ;;  %v84_v1 = vld [vmem:[#allocation4] ss:$0 sm:$0xff]  ;;  %vm45_vm0 = vcmask 261120  }
   0xb   :  { %v44_v2 = vmul.f32 %v84_v1, %v39_v0  ;;  %s143_s0 = smov 96   ;;  %vm73_vm5 = vcmask 7168  }
   0xd   :  { %v46_v3 = vsel %vm45_vm0, %v44_v2, 0.0 }
   0xe   :  { %47 = vadd.xlane.f32.xlu0 %v46_v3 }
  0x81   :  { %v48_v4 = vpop.xlane.xlu0 %47 }
  0x82   :  { %v49_v5 = vadd.f32 %v84_v1, %v48_v4 }
  0x84   :  { %v50_v6 = vsub.f32 0.0, %v49_v5 }
  0x86   :  { %v51_v7 = vmul.f32 1.442695, %v50_v6 }
  0x88   :  { %85 = vpow2.f32 %v51_v7 }
  0x8e   :  { %v86_v8 = vpop.eup %85 }
  0x8f   :  { %v53_v9 = vadd.f32 1.0, %v86_v8 }
  0x91   :  { %87 = vrcp.f32 %v53_v9  ;;  %v65_v13 = vand.u32 2147483648, %v53_v9  ;;  %v63_v15 = vand.u32 2147483647, %v53_v9  ;;  %vm59_vm2 = vweird.f32 %v53_v9 }
  0x93   :  { %v66_v17 = vor.u32 1.1754944e-38, %v65_v13  ;;  %vm64_vm4 = vcmp.eq.f32.partialorder %v63_v15, 8.507059e+37 }
  0x97   :  { %v88_v10 = vpop.eup %87 }
  0x98   :  { %v55_v11 = vmul.f32 %v88_v10, %v53_v9  ;;  %vm60_vm1 = vweird.f32 %v88_v10 }
  0x99   :  { %vm61_vm3 = vmor %vm59_vm2, %vm60_vm1 }
  0x9a   :  { %v56_v12 = vsub.f32 1.0, %v55_v11 }
  0x9c   :  { %v57_v14 = vmul.f32 %v88_v10, %v56_v12 }
  0x9e   :  { %v58_v16 = vadd.f32 %v88_v10, %v57_v14 }
  0xa0   :  { %v62_v18 = vsel %vm61_vm3, %v88_v10, %v58_v16 }
  0xa1   :  { %v67_v19 = vsel %vm64_vm4, %v66_v17, %v62_v18 }
  0xa2   :  { %70 = vrot.lane.b32.xlu0 %v67_v19, %s143_s0 }
 0x114   :  { %v71_v20 = vpop.permute.xlu0 %70 }
 0x115   :  { %74 = vst.msk [vmem:[%s170_s2] sm:$0xff] %vm73_vm5, %v71_v20 }
 0x116   :  { %79 = vsyncpa [#allocation3], 1 }
 0x117   :  { %80 = vsyncpa [#allocation5], 1 }

</bundles_post_ra>
